<compile_context>
chip_gen: v7x
topology: tpu7x:2x2x1
jax: 0.10.0
libtpu: 0.0.40
codegen_flags: <defaults>
</compile_context>

<pallas_src>
import jax
import jax.numpy as jnp
from jax.experimental import pallas as pl
from jax.experimental.pallas import tpu as pltpu

# ---------------- hyper-parameters (consistent with Actor.__init__) ----------
SLEVEL_MAX = 3
SLEVEL_MIN = 1
HIDDEN_DIM = 10
H_SIZE = 128
PAR_RS = False
CLUSTER_SPACE = 6 if PAR_RS else 4
TILE_SIZE = 512
DIM_LENGTH = SLEVEL_MAX * 8              # 24
ENC_HIDDEN = DIM_LENGTH * HIDDEN_DIM     # 240
PAD_DIM = 32                             # state padded 24 -> 32
ENC_PAD = 256                            # encoder hidden padded 240 -> 256
SMALL_WIDTH = 128                        # packed small-output width (lane-dense)
STOP_LANE = 64                           # lane holding the stop logit
PARALLEL_TEMP = 1.0
TILE_TEMP = 1.0
NEG_INF = -1e30                          # finite stand-in for float('-Inf') mask

assert CLUSTER_SPACE < STOP_LANE, "stop-logit lane would clobber a parallel logit"

_F32 = jnp.float32
_BF16 = jnp.bfloat16


# ----------------------------- shared kernel pieces --------------------------
def _linear(x, w_ref, b_ref):
    # bf16 weights, bf16 MXU inputs, f32 accumulation, f32 bias add.
    return jnp.dot(x.astype(_BF16), w_ref[...],
                   preferred_element_type=_F32) + b_ref[...]


def _relu(x):
    return jnp.maximum(x, 0.0)


def _encode_and_lstm(state_ref, h0_ref, c0_ref,
                     w1_ref, b1_ref, w2_ref, b2_ref,
                     w3_ref, b3_ref, w4_ref, b4_ref,
                     wl_ref, bl_ref):
    # ---- dim_encoder: Linear->ReLU x4 (lane-padded to 32 / 256) ----
    feat = _relu(_linear(state_ref[...], w1_ref, b1_ref))
    feat = _relu(_linear(feat, w2_ref, b2_ref))
    feat = _relu(_linear(feat, w3_ref, b3_ref))
    feat = _relu(_linear(feat, w4_ref, b4_ref))

    # ---- LSTMCell fused: gates = [feat, h0] @ [wih; whh] + (bih + bhh) ----
    xh = jnp.concatenate([feat, h0_ref[...]], axis=1)           # (1, 256)
    gates = _linear(xh, wl_ref, bl_ref)                          # (1, 512)
    H = H_SIZE
    i_g = jax.nn.sigmoid(gates[:, 0 * H:1 * H])
    f_g = jax.nn.sigmoid(gates[:, 1 * H:2 * H])
    g_g = jnp.tanh(gates[:, 2 * H:3 * H])
    o_g = jax.nn.sigmoid(gates[:, 3 * H:4 * H])
    c_new = f_g * c0_ref[...] + i_g * g_g
    h_new = o_g * jnp.tanh(c_new)
    return h_new, c_new


# ------------------------- kernel A: instruction == 0 ------------------------
def actor_parallel_kernel(state_ref, pmask_ref, h0_ref, c0_ref,
                          w1_ref, b1_ref, w2_ref, b2_ref,
                          w3_ref, b3_ref, w4_ref, b4_ref,
                          wl_ref, bl_ref,
                          whp_ref, bhp_ref,          # fused (parallel|stop) layer-1 (128,256)
                          wp2_ref, bp2_ref,          # parallel layer-2 (128,128 padded)
                          ws2_ref, bs2_ref,          # stop layer-2 as (1,128) row + (1,1) bias
                          out_ref):
    h_new, c_new = _encode_and_lstm(state_ref, h0_ref, c0_ref,
                                    w1_ref, b1_ref, w2_ref, b2_ref,
                                    w3_ref, b3_ref, w4_ref, b4_ref,
                                    wl_ref, bl_ref)

    # fused first layer of the parallel + stop heads
    hh = _relu(_linear(h_new, whp_ref, bhp_ref))                 # (1, 256)
    ph = hh[:, 0 * H_SIZE:1 * H_SIZE]
    sh = hh[:, 1 * H_SIZE:2 * H_SIZE]

    # parallel head logits (+ mask); temperature elided when == 1.0
    p_logits = _linear(ph, wp2_ref, bp2_ref) + pmask_ref[...]    # (1, 128), lanes 0:4 valid
    if PARALLEL_TEMP != 1.0:
        p_logits = p_logits * (1.0 / PARALLEL_TEMP)

    # stop head second layer as a VPU/XLU lane dot-product (avoids N=1 MXU pop)
    s_logit = jnp.sum(sh * ws2_ref[...], axis=-1, keepdims=True) + bs2_ref[...]

    # pack parallel logits + stop logit into one lane-dense (1,128) slab
    lane_idx = jax.lax.broadcasted_iota(jnp.int32, (1, SMALL_WIDTH), 1)
    small = jnp.where(lane_idx == STOP_LANE, s_logit, p_logits)

    # single merged lane-dense output: [h | c | small]  -> (1, 384)
    out_ref[...] = jnp.concatenate([h_new, c_new, small], axis=1)


# ------------------------- kernel B: instruction != 0 ------------------------
def actor_tile_kernel(last_tile_ref,                 # SMEM scalar (1,) int32
                      state_ref, h0_ref, c0_ref,
                      w1_ref, b1_ref, w2_ref, b2_ref,
                      w3_ref, b3_ref, w4_ref, b4_ref,
                      wl_ref, bl_ref,
                      wt1_ref, bt1_ref,              # tile layer-1 (128,128)
                      wt2_ref, bt2_ref,              # tile layer-2 (128,512)
                      out_ref):
    h_new, c_new = _encode_and_lstm(state_ref, h0_ref, c0_ref,
                                    w1_ref, b1_ref, w2_ref, b2_ref,
                                    w3_ref, b3_ref, w4_ref, b4_ref,
                                    wl_ref, bl_ref)

    th = _relu(_linear(h_new, wt1_ref, bt1_ref))                 # (1, 128)
    t_raw = _linear(th, wt2_ref, bt2_ref)                        # (1, 512)

    # in-kernel tile mask built from the SMEM scalar
    tile_iota = jax.lax.broadcasted_iota(jnp.int32, (1, TILE_SIZE), 1)
    tmask = jnp.where(tile_iota < last_tile_ref[0], 0.0, NEG_INF)
    t_logits = t_raw + tmask
    if TILE_TEMP != 1.0:
        t_logits = t_logits * (1.0 / TILE_TEMP)

    # single merged lane-dense output: [h | c | tile logits]  -> (1, 768)
    out_ref[...] = jnp.concatenate([h_new, c_new, t_logits], axis=1)


# --------------------------------- wrappers -----------------------------------
ENC_LSTM_PARAMS = ["w1", "b1", "w2", "b2", "w3", "b3", "w4", "b4", "wl", "bl"]
PAR_PARAMS = ENC_LSTM_PARAMS + ["whp", "bhp", "wp2", "bp2", "ws2", "bs2"]
TILE_PARAMS = ENC_LSTM_PARAMS + ["wt1", "bt1", "wt2", "bt2"]

_VMEM = pl.BlockSpec(memory_space=pltpu.MemorySpace.VMEM)
_SMEM = pl.BlockSpec(memory_space=pltpu.MemorySpace.SMEM)


def _call_parallel(state, pmask, h0, c0, params):
    inputs = (state, pmask, h0, c0) + tuple(params[k] for k in PAR_PARAMS)
    return pl.pallas_call(
        actor_parallel_kernel,
        out_shape=jax.ShapeDtypeStruct((1, 3 * H_SIZE), _F32),
        in_specs=[_VMEM] * len(inputs),
        out_specs=_VMEM,
    )(*inputs)


def _call_tile(last_tile, state, h0, c0, params):
    inputs = (last_tile, state, h0, c0) + tuple(params[k] for k in TILE_PARAMS)
    return pl.pallas_call(
        actor_tile_kernel,
        out_shape=jax.ShapeDtypeStruct((1, 2 * H_SIZE + TILE_SIZE), _F32),
        in_specs=[_SMEM] + [_VMEM] * (len(inputs) - 1),
        out_specs=_VMEM,
    )(*inputs)


@jax.jit
def parallel_step(params, state, pmask, h0, c0, rng):
    """instruction == 0: one dispatch = kernel + sampling + log-probs."""
    state = state.astype(_F32).reshape(1, DIM_LENGTH)
    state = jnp.pad(state, ((0, 0), (0, PAD_DIM - DIM_LENGTH)))
    pmask = pmask.astype(_F32).reshape(1, CLUSTER_SPACE)
    pmask = jnp.pad(pmask, ((0, 0), (0, SMALL_WIDTH - CLUSTER_SPACE)))

    packed = _call_parallel(state, pmask, h0, c0, params)        # (1, 384)
    h = packed[:, 0:H_SIZE]
    c = packed[:, H_SIZE:2 * H_SIZE]
    small = packed[:, 2 * H_SIZE:3 * H_SIZE]

    k1, k2 = jax.random.split(rng)
    p_logits = small[:, :CLUSTER_SPACE]
    parallel_action = jax.random.categorical(k1, p_logits, axis=-1)
    parallel_log_prob = jax.nn.log_softmax(p_logits, axis=-1)[0, parallel_action[0]]

    s_logit = small[0, STOP_LANE]
    p_stop = jax.nn.sigmoid(s_logit)
    stop_action = (jax.random.uniform(k2, (1,)) < p_stop).astype(_F32)
    # numerically-safe Bernoulli log-prob straight from the logit
    stop_log_prob = (stop_action * jax.nn.log_sigmoid(s_logit)
                     + (1.0 - stop_action) * jax.nn.log_sigmoid(-s_logit))
    return parallel_action, parallel_log_prob, stop_action, stop_log_prob, h, c


@jax.jit
def tile_step(params, state, last_tile, h0, c0, rng):
    """instruction != 0: one dispatch = kernel + sampling + log-prob."""
    state = state.astype(_F32).reshape(1, DIM_LENGTH)
    state = jnp.pad(state, ((0, 0), (0, PAD_DIM - DIM_LENGTH)))

    packed = _call_tile(last_tile, state, h0, c0, params)        # (1, 768)
    h = packed[:, 0:H_SIZE]
    c = packed[:, H_SIZE:2 * H_SIZE]
    t_logits = packed[:, 2 * H_SIZE:]

    tile_action = jax.random.categorical(rng, t_logits, axis=-1)
    tile_log_prob = jax.nn.log_softmax(t_logits, axis=-1)[0, tile_action[0]]
    return tile_action, tile_log_prob, h, c


# --------------------------------- params -------------------------------------
def make_params(key):
    ks = list(jax.random.split(key, 20))

    def xavier(k, fan_in, fan_out):
        bound = (6.0 / (fan_in + fan_out)) ** 0.5
        return jax.random.uniform(k, (fan_in, fan_out), _F32, -bound, bound)

    def zeros_b(n):
        return jnp.zeros((1, n), _F32)

    ortho = jax.nn.initializers.orthogonal()
    k_lstm = 1.0 / (H_SIZE ** 0.5)

    # encoder weights, lane-padded: (24,240)->(32,256), (240,128)->(256,128)
    w1 = jnp.zeros((PAD_DIM, ENC_PAD), _F32)
    w1 = w1.at[:DIM_LENGTH, :ENC_HIDDEN].set(xavier(ks[0], DIM_LENGTH, ENC_HIDDEN))
    w2 = jnp.zeros((ENC_PAD, H_SIZE), _F32)
    w2 = w2.at[:ENC_HIDDEN, :].set(xavier(ks[1], ENC_HIDDEN, H_SIZE))

    # fused LSTM weight: [wih; whh] (256, 512), fused bias = bih + bhh
    wih = ortho(ks[4], (4 * H_SIZE, H_SIZE)).T.astype(_F32)      # (128, 512)
    whh = ortho(ks[6], (4 * H_SIZE, H_SIZE)).T.astype(_F32)      # (128, 512)
    bih = jax.random.uniform(ks[5], (1, 4 * H_SIZE), _F32, -k_lstm, k_lstm)
    bhh = jax.random.uniform(ks[7], (1, 4 * H_SIZE), _F32, -k_lstm, k_lstm)
    wl = jnp.concatenate([wih, whh], axis=0)                     # (256, 512)
    bl = bih + bhh

    # fused first layer of the (parallel | stop) heads: (128, 256)
    wp1 = xavier(ks[8], H_SIZE, H_SIZE)
    ws1 = xavier(ks[12], H_SIZE, H_SIZE)
    whp = jnp.concatenate([wp1, ws1], axis=1)                    # (128, 256)
    bhp = zeros_b(2 * H_SIZE)

    # parallel head second layer padded to 128 lanes
    wp2 = jnp.zeros((H_SIZE, SMALL_WIDTH), _F32)
    wp2 = wp2.at[:, :CLUSTER_SPACE].set(xavier(ks[9], H_SIZE, CLUSTER_SPACE))
    bp2 = zeros_b(SMALL_WIDTH)

    # tile head
    wt1 = xavier(ks[10], H_SIZE, H_SIZE)
    bt1 = zeros_b(H_SIZE)
    wt2 = xavier(ks[11], H_SIZE, TILE_SIZE)
    bt2 = zeros_b(TILE_SIZE)

    # stop head second layer stored as a (1, 128) row (VPU dot-product, f32)
    ws2 = xavier(ks[13], H_SIZE, 1).reshape(1, H_SIZE)
    bs2 = zeros_b(1)

    return {
        "w1": w1.astype(_BF16), "b1": zeros_b(ENC_PAD),
        "w2": w2.astype(_BF16), "b2": zeros_b(H_SIZE),
        "w3": xavier(ks[2], H_SIZE, H_SIZE).astype(_BF16), "b3": zeros_b(H_SIZE),
        "w4": xavier(ks[3], H_SIZE, H_SIZE).astype(_BF16), "b4": zeros_b(H_SIZE),
        "wl": wl.astype(_BF16), "bl": bl,
        "whp": whp.astype(_BF16), "bhp": bhp,
        "wp2": wp2.astype(_BF16), "bp2": bp2,
        "wt1": wt1.astype(_BF16), "bt1": bt1,
        "wt2": wt2.astype(_BF16), "bt2": bt2,
        "ws2": ws2, "bs2": bs2,               # f32 (VPU path)
    }


def init_hidden():
    return (jnp.zeros((1, H_SIZE), _F32), jnp.zeros((1, H_SIZE), _F32))


# ------------------------------ forward (module API) --------------------------
def actor_forward(params, state_info, lstm_value, rng):
    """Mirrors Actor.forward; returns (result_tuple, new_lstm_value)."""
    state = jnp.asarray(state_info["state"], _F32)
    instruction = state_info["instruction"]          # Python-static branch
    h0, c0 = lstm_value

    if instruction == 0:
        pmask = jnp.asarray(state_info["parallel_mask"], _F32)
        pa, plp, sa, slp, h, c = parallel_step(params, state, pmask, h0, c0, rng)
        new_lstm = (h, c)
        if state_info["cur_levels"] > SLEVEL_MIN:
            return ([sa, pa], [slp, plp], False), new_lstm
        return (pa, plp, False), new_lstm
    else:
        # last_level_tiles is a host-side list -> plain Python indexing, no sync
        last_level_tile = int(state_info["last_level_tiles"][instruction - 2])
        last_tile_arr = jnp.full((1,), last_level_tile, jnp.int32)
        ta, tlp, h, c = tile_step(params, state, last_tile_arr, h0, c0, rng)
        return (ta, tlp, last_level_tile == 1), (h, c)


# --------------------------------- main ----------------------------------------
if __name__ == "__main__":
    root = jax.random.PRNGKey(0)
    k_params, k_state, k_samp0, k_samp1 = jax.random.split(root, 4)

    params = make_params(k_params)
    lstm_value = init_hidden()

    state = jax.random.normal(k_state, (DIM_LENGTH,), _F32)
    parallel_mask = jnp.zeros((CLUSTER_SPACE,), _F32)
    last_level_tiles = [162, 161, 224, 224, 7, 7]

    # instruction == 0 path (parallel + stop heads)
    info0 = dict(state=state, parallel_mask=parallel_mask, instruction=0,
                 last_level_tiles=last_level_tiles, cur_levels=2)
    (out0, logp0, done0), lstm_value = actor_forward(params, info0, lstm_value, k_samp0)
    jax.block_until_ready(out0[1])
    jax.block_until_ready(logp0[0])

    # instruction != 0 path (tile head with -inf mask above last_level_tile)
    info1 = dict(state=state, parallel_mask=parallel_mask, instruction=3,
                 last_level_tiles=last_level_tiles, cur_levels=2)
    (tile_action, tile_logp, done1), lstm_value = actor_forward(
        params, info1, lstm_value, k_samp1)
    jax.block_until_ready(tile_action)
    jax.block_until_ready(tile_logp)

    assert out0[1].shape == (1,)                       # parallel_action
    assert int(tile_action[0]) < last_level_tiles[1]   # respects tile mask
    assert bool(jnp.isfinite(tile_logp))
    print("KERNEL_OK")
</pallas_src>

<mosaic_0001>
module attributes {stable_mosaic.version = 11 : i64} {
  func.func @actor_parallel_kernel(%arg0: memref<1x32xf32, #tpu.memory_space<vmem>>, %arg1: memref<1x128xf32, #tpu.memory_space<vmem>>, %arg2: memref<1x128xf32, #tpu.memory_space<vmem>>, %arg3: memref<1x128xf32, #tpu.memory_space<vmem>>, %arg4: memref<32x256xbf16, #tpu.memory_space<vmem>>, %arg5: memref<1x256xf32, #tpu.memory_space<vmem>>, %arg6: memref<256x128xbf16, #tpu.memory_space<vmem>>, %arg7: memref<1x128xf32, #tpu.memory_space<vmem>>, %arg8: memref<128x128xbf16, #tpu.memory_space<vmem>>, %arg9: memref<1x128xf32, #tpu.memory_space<vmem>>, %arg10: memref<128x128xbf16, #tpu.memory_space<vmem>>, %arg11: memref<1x128xf32, #tpu.memory_space<vmem>>, %arg12: memref<256x512xbf16, #tpu.memory_space<vmem>>, %arg13: memref<1x512xf32, #tpu.memory_space<vmem>>, %arg14: memref<128x256xbf16, #tpu.memory_space<vmem>>, %arg15: memref<1x256xf32, #tpu.memory_space<vmem>>, %arg16: memref<128x128xbf16, #tpu.memory_space<vmem>>, %arg17: memref<1x128xf32, #tpu.memory_space<vmem>>, %arg18: memref<1x128xf32, #tpu.memory_space<vmem>>, %arg19: memref<1x1xf32, #tpu.memory_space<vmem>>, %arg20: memref<1x384xf32, #tpu.memory_space<vmem>>) attributes {dimension_semantics = [], scalar_prefetch = 0 : i64, scratch_operands = 0 : i64, tpu.core_type = #tpu.core_type<tc>} {
    %c0 = arith.constant 0 : index
    %c0_0 = arith.constant 0 : index
    %0 = vector.load %arg0[%c0, %c0_0] : memref<1x32xf32, #tpu.memory_space<vmem>>, vector<1x32xf32>
    %1 = arith.truncf %0 : vector<1x32xf32> to vector<1x32xbf16>
    %c0_1 = arith.constant 0 : index
    %c0_2 = arith.constant 0 : index
    %2 = vector.load %arg4[%c0_1, %c0_2] : memref<32x256xbf16, #tpu.memory_space<vmem>>, vector<32x256xbf16>
    %cst = arith.constant dense<0.000000e+00> : vector<1x256xf32>
    %3 = tpu.matmul %1, %2, %cst {dimension_numbers = #tpu.dot_dimension_numbers<[1], [0], [0], [1], [0, 0, 1, 1], [], []>} : vector<1x32xbf16>, vector<32x256xbf16>, vector<1x256xf32> -> vector<1x256xf32>
    %c0_3 = arith.constant 0 : index
    %c0_4 = arith.constant 0 : index
    %4 = vector.load %arg5[%c0_3, %c0_4] : memref<1x256xf32, #tpu.memory_space<vmem>>, vector<1x256xf32>
    %5 = arith.addf %3, %4 : vector<1x256xf32>
    %cst_5 = arith.constant 0.000000e+00 : f32
    %6 = vector.broadcast %cst_5 : f32 to vector<1x256xf32>
    %7 = arith.maximumf %5, %6 : vector<1x256xf32>
    %8 = arith.truncf %7 : vector<1x256xf32> to vector<1x256xbf16>
    %c0_6 = arith.constant 0 : index
    %c0_7 = arith.constant 0 : index
    %9 = vector.load %arg6[%c0_6, %c0_7] : memref<256x128xbf16, #tpu.memory_space<vmem>>, vector<256x128xbf16>
    %cst_8 = arith.constant dense<0.000000e+00> : vector<1x128xf32>
    %10 = tpu.matmul %8, %9, %cst_8 {dimension_numbers = #tpu.dot_dimension_numbers<[1], [0], [0], [1], [0, 0, 1, 1], [], []>} : vector<1x256xbf16>, vector<256x128xbf16>, vector<1x128xf32> -> vector<1x128xf32>
    %c0_9 = arith.constant 0 : index
    %c0_10 = arith.constant 0 : index
    %11 = vector.load %arg7[%c0_9, %c0_10] : memref<1x128xf32, #tpu.memory_space<vmem>>, vector<1x128xf32>
    %12 = arith.addf %10, %11 : vector<1x128xf32>
    %cst_11 = arith.constant 0.000000e+00 : f32
    %13 = vector.broadcast %cst_11 : f32 to vector<1x128xf32>
    %14 = arith.maximumf %12, %13 : vector<1x128xf32>
    %15 = arith.truncf %14 : vector<1x128xf32> to vector<1x128xbf16>
    %c0_12 = arith.constant 0 : index
    %c0_13 = arith.constant 0 : index
    %16 = vector.load %arg8[%c0_12, %c0_13] : memref<128x128xbf16, #tpu.memory_space<vmem>>, vector<128x128xbf16>
    %cst_14 = arith.constant dense<0.000000e+00> : vector<1x128xf32>
    %17 = tpu.matmul %15, %16, %cst_14 {dimension_numbers = #tpu.dot_dimension_numbers<[1], [0], [0], [1], [0, 0, 1, 1], [], []>} : vector<1x128xbf16>, vector<128x128xbf16>, vector<1x128xf32> -> vector<1x128xf32>
    %c0_15 = arith.constant 0 : index
    %c0_16 = arith.constant 0 : index
    %18 = vector.load %arg9[%c0_15, %c0_16] : memref<1x128xf32, #tpu.memory_space<vmem>>, vector<1x128xf32>
    %19 = arith.addf %17, %18 : vector<1x128xf32>
    %cst_17 = arith.constant 0.000000e+00 : f32
    %20 = vector.broadcast %cst_17 : f32 to vector<1x128xf32>
    %21 = arith.maximumf %19, %20 : vector<1x128xf32>
    %22 = arith.truncf %21 : vector<1x128xf32> to vector<1x128xbf16>
    %c0_18 = arith.constant 0 : index
    %c0_19 = arith.constant 0 : index
    %23 = vector.load %arg10[%c0_18, %c0_19] : memref<128x128xbf16, #tpu.memory_space<vmem>>, vector<128x128xbf16>
    %cst_20 = arith.constant dense<0.000000e+00> : vector<1x128xf32>
    %24 = tpu.matmul %22, %23, %cst_20 {dimension_numbers = #tpu.dot_dimension_numbers<[1], [0], [0], [1], [0, 0, 1, 1], [], []>} : vector<1x128xbf16>, vector<128x128xbf16>, vector<1x128xf32> -> vector<1x128xf32>
    %c0_21 = arith.constant 0 : index
    %c0_22 = arith.constant 0 : index
    %25 = vector.load %arg11[%c0_21, %c0_22] : memref<1x128xf32, #tpu.memory_space<vmem>>, vector<1x128xf32>
    %26 = arith.addf %24, %25 : vector<1x128xf32>
    %cst_23 = arith.constant 0.000000e+00 : f32
    %27 = vector.broadcast %cst_23 : f32 to vector<1x128xf32>
    %28 = arith.maximumf %26, %27 : vector<1x128xf32>
    %c0_24 = arith.constant 0 : index
    %c0_25 = arith.constant 0 : index
    %29 = vector.load %arg2[%c0_24, %c0_25] : memref<1x128xf32, #tpu.memory_space<vmem>>, vector<1x128xf32>
    %30 = tpu.concatenate %28, %29 in 1 : vector<1x128xf32>, vector<1x128xf32> -> vector<1x256xf32>
    %31 = arith.truncf %30 : vector<1x256xf32> to vector<1x256xbf16>
    %c0_26 = arith.constant 0 : index
    %c0_27 = arith.constant 0 : index
    %32 = vector.load %arg12[%c0_26, %c0_27] : memref<256x512xbf16, #tpu.memory_space<vmem>>, vector<256x512xbf16>
    %cst_28 = arith.constant dense<0.000000e+00> : vector<1x512xf32>
    %33 = tpu.matmul %31, %32, %cst_28 {dimension_numbers = #tpu.dot_dimension_numbers<[1], [0], [0], [1], [0, 0, 1, 1], [], []>} : vector<1x256xbf16>, vector<256x512xbf16>, vector<1x512xf32> -> vector<1x512xf32>
    %c0_29 = arith.constant 0 : index
    %c0_30 = arith.constant 0 : index
    %34 = vector.load %arg13[%c0_29, %c0_30] : memref<1x512xf32, #tpu.memory_space<vmem>>, vector<1x512xf32>
    %35 = arith.addf %33, %34 : vector<1x512xf32>
    %36 = vector.extract_strided_slice %35 {offsets = [0, 0], sizes = [1, 128], strides = [1, 1]} : vector<1x512xf32> to vector<1x128xf32>
    %37 = arith.negf %36 : vector<1x128xf32>
    %38 = math.exp %37 : vector<1x128xf32>
    %cst_31 = arith.constant 1.000000e+00 : f32
    %39 = vector.broadcast %cst_31 : f32 to vector<1x128xf32>
    %40 = arith.addf %39, %38 : vector<1x128xf32>
    %41 = arith.divf %39, %40 : vector<1x128xf32>
    %42 = vector.extract_strided_slice %35 {offsets = [0, 128], sizes = [1, 128], strides = [1, 1]} : vector<1x512xf32> to vector<1x128xf32>
    %43 = arith.negf %42 : vector<1x128xf32>
    %44 = math.exp %43 : vector<1x128xf32>
    %cst_32 = arith.constant 1.000000e+00 : f32
    %45 = vector.broadcast %cst_32 : f32 to vector<1x128xf32>
    %46 = arith.addf %45, %44 : vector<1x128xf32>
    %47 = arith.divf %45, %46 : vector<1x128xf32>
    %48 = vector.extract_strided_slice %35 {offsets = [0, 256], sizes = [1, 128], strides = [1, 1]} : vector<1x512xf32> to vector<1x128xf32>
    %49 = math.tanh %48 : vector<1x128xf32>
    %50 = vector.extract_strided_slice %35 {offsets = [0, 384], sizes = [1, 128], strides = [1, 1]} : vector<1x512xf32> to vector<1x128xf32>
    %51 = arith.negf %50 : vector<1x128xf32>
    %52 = math.exp %51 : vector<1x128xf32>
    %cst_33 = arith.constant 1.000000e+00 : f32
    %53 = vector.broadcast %cst_33 : f32 to vector<1x128xf32>
    %54 = arith.addf %53, %52 : vector<1x128xf32>
    %55 = arith.divf %53, %54 : vector<1x128xf32>
    %c0_34 = arith.constant 0 : index
    %c0_35 = arith.constant 0 : index
    %56 = vector.load %arg3[%c0_34, %c0_35] : memref<1x128xf32, #tpu.memory_space<vmem>>, vector<1x128xf32>
    %57 = arith.mulf %47, %56 : vector<1x128xf32>
    %58 = arith.mulf %41, %49 : vector<1x128xf32>
    %59 = arith.addf %57, %58 : vector<1x128xf32>
    %60 = math.tanh %59 : vector<1x128xf32>
    %61 = arith.mulf %55, %60 : vector<1x128xf32>
    %62 = arith.truncf %61 : vector<1x128xf32> to vector<1x128xbf16>
    %c0_36 = arith.constant 0 : index
    %c0_37 = arith.constant 0 : index
    %63 = vector.load %arg14[%c0_36, %c0_37] : memref<128x256xbf16, #tpu.memory_space<vmem>>, vector<128x256xbf16>
    %cst_38 = arith.constant dense<0.000000e+00> : vector<1x256xf32>
    %64 = tpu.matmul %62, %63, %cst_38 {dimension_numbers = #tpu.dot_dimension_numbers<[1], [0], [0], [1], [0, 0, 1, 1], [], []>} : vector<1x128xbf16>, vector<128x256xbf16>, vector<1x256xf32> -> vector<1x256xf32>
    %c0_39 = arith.constant 0 : index
    %c0_40 = arith.constant 0 : index
    %65 = vector.load %arg15[%c0_39, %c0_40] : memref<1x256xf32, #tpu.memory_space<vmem>>, vector<1x256xf32>
    %66 = arith.addf %64, %65 : vector<1x256xf32>
    %cst_41 = arith.constant 0.000000e+00 : f32
    %67 = vector.broadcast %cst_41 : f32 to vector<1x256xf32>
    %68 = arith.maximumf %66, %67 : vector<1x256xf32>
    %69 = vector.extract_strided_slice %68 {offsets = [0, 0], sizes = [1, 128], strides = [1, 1]} : vector<1x256xf32> to vector<1x128xf32>
    %70 = vector.extract_strided_slice %68 {offsets = [0, 128], sizes = [1, 128], strides = [1, 1]} : vector<1x256xf32> to vector<1x128xf32>
    %71 = arith.truncf %69 : vector<1x128xf32> to vector<1x128xbf16>
    %c0_42 = arith.constant 0 : index
    %c0_43 = arith.constant 0 : index
    %72 = vector.load %arg16[%c0_42, %c0_43] : memref<128x128xbf16, #tpu.memory_space<vmem>>, vector<128x128xbf16>
    %cst_44 = arith.constant dense<0.000000e+00> : vector<1x128xf32>
    %73 = tpu.matmul %71, %72, %cst_44 {dimension_numbers = #tpu.dot_dimension_numbers<[1], [0], [0], [1], [0, 0, 1, 1], [], []>} : vector<1x128xbf16>, vector<128x128xbf16>, vector<1x128xf32> -> vector<1x128xf32>
    %c0_45 = arith.constant 0 : index
    %c0_46 = arith.constant 0 : index
    %74 = vector.load %arg17[%c0_45, %c0_46] : memref<1x128xf32, #tpu.memory_space<vmem>>, vector<1x128xf32>
    %75 = arith.addf %73, %74 : vector<1x128xf32>
    %c0_47 = arith.constant 0 : index
    %c0_48 = arith.constant 0 : index
    %76 = vector.load %arg1[%c0_47, %c0_48] : memref<1x128xf32, #tpu.memory_space<vmem>>, vector<1x128xf32>
    %77 = arith.addf %75, %76 : vector<1x128xf32>
    %c0_49 = arith.constant 0 : index
    %c0_50 = arith.constant 0 : index
    %78 = vector.load %arg18[%c0_49, %c0_50] : memref<1x128xf32, #tpu.memory_space<vmem>>, vector<1x128xf32>
    %79 = arith.mulf %70, %78 : vector<1x128xf32>
    %cst_51 = arith.constant dense<0.000000e+00> : vector<1xf32>
    %80 = vector.multi_reduction <add>, %79, %cst_51 [1] : vector<1x128xf32> to vector<1xf32>
    %81 = vector.shape_cast %80 : vector<1xf32> to vector<1x1xf32>
    %c0_52 = arith.constant 0 : index
    %c0_53 = arith.constant 0 : index
    %82 = vector.load %arg19[%c0_52, %c0_53] : memref<1x1xf32, #tpu.memory_space<vmem>>, vector<1x1xf32>
    %83 = arith.addf %81, %82 : vector<1x1xf32>
    %84 = tpu.iota {dimensions = array<i32: 1>} : vector<1x128xi32>
    %c64_i32 = arith.constant 64 : i32
    %85 = vector.broadcast %c64_i32 : i32 to vector<1x128xi32>
    %86 = arith.cmpi eq, %84, %85 : vector<1x128xi32>
    %87 = vector.shape_cast %83 : vector<1x1xf32> to vector<1x1xf32>
    %88 = vector.broadcast %87 : vector<1x1xf32> to vector<1x128xf32>
    %89 = arith.select %86, %88, %77 : vector<1x128xi1>, vector<1x128xf32>
    %90 = tpu.concatenate %61, %59, %89 in 1 : vector<1x128xf32>, vector<1x128xf32>, vector<1x128xf32> -> vector<1x384xf32>
    %c0_54 = arith.constant 0 : index
    %c0_55 = arith.constant 0 : index
    %91 = vector.load %arg20[%c0_54, %c0_55] : memref<1x384xf32, #tpu.memory_space<vmem>>, vector<1x384xf32>
    tpu.vector_store %arg20[%c0_54, %c0_55], %90 {strides = array<i32>} : memref<1x384xf32, #tpu.memory_space<vmem>>, vector<1x384xf32>,
    return
  }
}

</mosaic_0001>

<bundles_post_ra>
// kernel: parallel_step.3
= control target key start
LH: loop header
LB: loop body
LE: loop exit
PB: predicated region body
PF: predicated region fallthrough
CT: control target
= control target key end

     0   :  { %s2381_s0 = inlined_call_operand.vmem [shape: f32[1,32], index: 0, kind: input, shape index: {}]   ;;  %s2382_s1 = inlined_call_operand.vmem [shape: f32[1,128], index: 1, kind: input, shape index: {}]   ;;  %s2383_s2 = inlined_call_operand.vmem [shape: f32[1,128], index: 2, kind: input, shape index: {}]   ;;  %s2384_s3 = inlined_call_operand.vmem [shape: f32[1,128], index: 3, kind: input, shape index: {}]   ;;  %s2385_s4 = inlined_call_operand.hbm [shape: bf16[32,256], index: 4, kind: input, shape index: {}]   ;;  %s2386_s5 = inlined_call_operand.vmem [shape: f32[1,256], index: 5, kind: input, shape index: {}]   ;;  %s2387_s6 = inlined_call_operand.vmem [shape: bf16[256,128], index: 6, kind: input, shape index: {}]   ;;  %s2388_s7 = inlined_call_operand.vmem [shape: f32[1,128], index: 7, kind: input, shape index: {}]   ;;  %s2389_s8 = inlined_call_operand.hbm [shape: bf16[128,128], index: 8, kind: input, shape index: {}]   ;;  %s2390_s9 = inlined_call_operand.vmem [shape: f32[1,128], index: 9, kind: input, shape index: {}]   ;;  %s2391_s10 = inlined_call_operand.hbm [shape: bf16[128,128], index: 10, kind: input, shape index: {}]   ;;  %s2392_s11 = inlined_call_operand.vmem [shape: f32[1,128], index: 11, kind: input, shape index: {}]   ;;  %s2393_s12 = inlined_call_operand.hbm [shape: bf16[256,512], index: 12, kind: input, shape index: {}]   ;;  %s2394_s13 = inlined_call_operand.vmem [shape: f32[1,512], index: 13, kind: input, shape index: {}]   ;;  %s2395_s14 = inlined_call_operand.hbm [shape: bf16[128,256], index: 14, kind: input, shape index: {}]   ;;  %s2396_s15 = inlined_call_operand.vmem [shape: f32[1,256], index: 15, kind: input, shape index: {}]   ;;  %s2397_s16 = inlined_call_operand.hbm [shape: bf16[128,128], index: 16, kind: input, shape index: {}]   ;;  %s2398_s17 = inlined_call_operand.vmem [shape: f32[1,128], index: 17, kind: input, shape index: {}]   ;;  %s2399_s18 = inlined_call_operand.vmem [shape: f32[1,128], index: 18, kind: input, shape index: {}]   ;;  %s2400_s19 = inlined_call_operand.<no memory space> [shape: f32[1,1], index: 19, kind: input, shape index: {}]   ;;  %s2401_s20 = inlined_call_operand.vmem [shape: f32[1,384], index: 20, kind: output, shape index: {}]  }
   0x1   :  { %2405 = sst [smem:[#allocation17_spill]] %s2381_s0  ;;  %v25_v0 = vstv %s2400_s19 }
   0x2   :  { %2406 = sst [smem:[#allocation18_spill]] %s2382_s1  ;;  %26 = vst [vmem:[#allocation2] sm:$0x1] %v25_v0 }
   0x3   :  { %2407 = sst [smem:[#allocation19_spill]] %s2383_s2 }
   0x4   :  { %2408 = sst [smem:[#allocation20_spill]] %s2384_s3 }
   0x5   :  { %2409 = sst [smem:[#allocation21_spill]] %s2385_s4 }
   0x6   :  { %27 = vsyncpa [#allocation4], 0 }
   0x7   :  { %28 = vsyncpa [#allocation6], 0 }
   0x8   :  { %29 = vsyncpa [#allocation9], 0 }
   0x9   :  { %30 = vsyncpa [#allocation12], 0  ;;  %s2030_s23 = smov [#allocation5]   ;;  %s1890_s3 = scalar_lea.hbm %s2389_s8, 1024 }
   0xa   :  { %s62_s24 = sshll.u32 %s2030_s23, 4  ;;  %p1891_p0 = scmp.ne.s32.totalorder %s2389_s8, %s1890_s3  ;;  %s63_s24 = int_to_ptr.vmem [resolvable:$true] %s62_s24 }
   0xb   :  { %p1894_p1 = scmp.lt.u32.totalorder %s1890_s3, %s2389_s8 }
   0xd   :  { %p1896_p2 = pnand %p1894_p1, %p1891_p0 }
   0xf   :  { %1899 = shalt.err (!%p1896_p2)
}
  0x10   :  { %s1900_s19 = scalar_lea.vmem %s63_s24, 1024  ;;  %p1905_p4 = scmp.lt.s32.totalorder %s63_s24, %s63_s24 }
  0x11   :  { %p1901_p3 = scmp.ne.s32.totalorder %s63_s24, %s1900_s19  ;;  %p1906_p5 = scmp.lt.s32.totalorder %s1900_s19, %s1900_s19 }
  0x13   :  { %p1907_p6 = por %p1906_p5, %p1905_p4 }
  0x15   :  { %p1908_p7 = pnand %p1907_p6, %p1901_p3 }
  0x17   :  { %1911 = shalt.err (!%p1908_p7)
}
  0x18   :  { %s2403_s29 = smov 64   ;;  %s2032_s30 = smov 4  }
  0x19   :  { %68 = dma.hbm_to_vmem [thread:$0]  %s2389_s8, 1024, %s63_s24, [#allocation6], %s2403_s29, %s2403_s29, %s2032_s30  }
  0x1a   :  { %s2033_s1 = smov [#allocation8]   ;;  %s1912_s25 = scalar_lea.hbm %s2393_s12, 8192 }
  0x1b   :  { %s90_s22 = sshll.u32 %s2033_s1, 4  ;;  %p1913_p8 = scmp.ne.s32.totalorder %s2393_s12, %s1912_s25  ;;  %s91_s22 = int_to_ptr.vmem [resolvable:$true] %s90_s22 }
  0x1c   :  { %p1916_p9 = scmp.lt.u32.totalorder %s1912_s25, %s2393_s12 }
  0x1e   :  { %p1918_p10 = pnand %p1916_p9, %p1913_p8 }
  0x20   :  { %1921 = shalt.err (!%p1918_p10)
}
  0x21   :  { %s1922_s4 = scalar_lea.vmem %s91_s22, 8192  ;;  %p1927_p12 = scmp.lt.s32.totalorder %s91_s22, %s91_s22 }
  0x22   :  { %p1923_p11 = scmp.ne.s32.totalorder %s91_s22, %s1922_s4  ;;  %p1928_p13 = scmp.lt.s32.totalorder %s1922_s4, %s1922_s4 }
  0x24   :  { %p1929_p0 = por %p1928_p13, %p1927_p12 }
  0x26   :  { %p1930_p1 = pnand %p1929_p0, %p1923_p11 }
  0x28   :  { %1933 = shalt.err (!%p1930_p1)
}
  0x29   :  { %s2034_s8 = smov 256   ;;  %s2035_s24 = smov 16  }
  0x2a   :  { %96 = dma.hbm_to_vmem [thread:$0]  %s2393_s12, 8192, %s91_s22, [#allocation9], %s2034_s8, %s2034_s8, %s2035_s24  }
  0x2b   :  { %s2036_s21 = smov [#allocation3]   ;;  %s2410_s25 = sld [smem:[#allocation21_spill]] }
  0x2c   :  { %s44_s1 = sshll.u32 %s2036_s21, 4  ;;  %s45_s1 = int_to_ptr.vmem [resolvable:$true] %s44_s1 }
  0x31   :  { %s1934_s3 = scalar_lea.hbm %s2410_s25, 512 }
  0x32   :  { %p1935_p2 = scmp.ne.s32.totalorder %s2410_s25, %s1934_s3  ;;  %p1938_p3 = scmp.lt.u32.totalorder %s1934_s3, %s2410_s25 }
  0x34   :  { %p1940_p4 = pnand %p1938_p3, %p1935_p2 }
  0x36   :  { %1943 = shalt.err (!%p1940_p4)
}
  0x37   :  { %s1944_s29 = scalar_lea.vmem %s45_s1, 512  ;;  %p1949_p6 = scmp.lt.s32.totalorder %s45_s1, %s45_s1 }
  0x38   :  { %p1945_p5 = scmp.ne.s32.totalorder %s45_s1, %s1944_s29  ;;  %p1950_p7 = scmp.lt.s32.totalorder %s1944_s29, %s1944_s29 }
  0x3a   :  { %p1951_p8 = por %p1950_p7, %p1949_p6 }
  0x3c   :  { %p1952_p9 = pnand %p1951_p8, %p1945_p5 }
  0x3e   :  { %1955 = shalt.err (!%p1952_p9)
}
  0x3f   :  { %s2037_s12 = smov 128   ;;  %s2038_s22 = smov 8  }
  0x40   :  { %50 = dma.hbm_to_vmem [thread:$0]  %s2410_s25, 512, %s45_s1, [#allocation4], %s2037_s12, %s2037_s12, %s2038_s22  }
  0x41   :  { %s2039_s19 = smov [#allocation7]   ;;  %s2040_s21 = smov [#allocation10]  }
  0x42   :  { %s76_s0 = sshll.u32 %s2039_s19, 4  ;;  %s104_s23 = sshll.u32 %s2040_s21, 4  ;;  %s77_s0 = int_to_ptr.vmem [resolvable:$true] %s76_s0  ;;  %s105_s23 = int_to_ptr.vmem [resolvable:$true] %s104_s23 }
  0x43   :  { %s1956_s29 = scalar_lea.hbm %s2391_s10, 1024 }
  0x44   :  { %p1957_p10 = scmp.ne.s32.totalorder %s2391_s10, %s1956_s29  ;;  %p1960_p11 = scmp.lt.u32.totalorder %s1956_s29, %s2391_s10 }
  0x46   :  { %p1962_p12 = pnand %p1960_p11, %p1957_p10 }
  0x48   :  { %1965 = shalt.err (!%p1962_p12)
}
  0x49   :  { %s1966_s1 = scalar_lea.vmem %s77_s0, 1024  ;;  %p1971_p0 = scmp.lt.s32.totalorder %s77_s0, %s77_s0 }
  0x4a   :  { %p1967_p13 = scmp.ne.s32.totalorder %s77_s0, %s1966_s1  ;;  %p1972_p1 = scmp.lt.s32.totalorder %s1966_s1, %s1966_s1 }
  0x4c   :  { %p1973_p2 = por %p1972_p1, %p1971_p0 }
  0x4e   :  { %p1974_p3 = pnand %p1973_p2, %p1967_p13 }
  0x50   :  { %1977 = shalt.err (!%p1974_p3)
}
  0x51   :  { %s2411_s25 = smov 64   ;;  %s1978_s2 = scalar_lea.hbm %s2395_s14, 2048 }
  0x52   :  { %82 = dma.hbm_to_vmem [thread:$0]  %s2391_s10, 1024, %s77_s0, [#allocation6], %s2411_s25, %s2411_s25, %s2032_s30  }
  0x53   :  { %p1979_p4 = scmp.ne.s32.totalorder %s2395_s14, %s1978_s2  ;;  %p1982_p5 = scmp.lt.u32.totalorder %s1978_s2, %s2395_s14 }
  0x55   :  { %p1984_p6 = pnand %p1982_p5, %p1979_p4 }
  0x57   :  { %1987 = shalt.err (!%p1984_p6)
}
  0x58   :  { %s1988_s28 = scalar_lea.vmem %s105_s23, 2048  ;;  %p1993_p8 = scmp.lt.s32.totalorder %s105_s23, %s105_s23 }
  0x59   :  { %p1989_p7 = scmp.ne.s32.totalorder %s105_s23, %s1988_s28  ;;  %p1994_p9 = scmp.lt.s32.totalorder %s1988_s28, %s1988_s28 }
  0x5b   :  { %p1995_p10 = por %p1994_p9, %p1993_p8 }
  0x5d   :  { %p1996_p11 = pnand %p1995_p10, %p1989_p7 }
  0x5f   :  { %1999 = shalt.err (!%p1996_p11)
}
  0x60   :  { %110 = dma.hbm_to_vmem [thread:$0]  %s2395_s14, 2048, %s105_s23, [#allocation9], %s2037_s12, %s2037_s12, %s2038_s22  }
  0x61   :  { %s2041_s4 = smov [#allocation11]   ;;  %s2000_s19 = scalar_lea.hbm %s2397_s16, 1024 }
  0x62   :  { %s118_s1 = sshll.u32 %s2041_s4, 4  ;;  %p2001_p12 = scmp.ne.s32.totalorder %s2397_s16, %s2000_s19  ;;  %s119_s1 = int_to_ptr.vmem [resolvable:$true] %s118_s1 }
  0x63   :  { %p2004_p13 = scmp.lt.u32.totalorder %s2000_s19, %s2397_s16 }
  0x65   :  { %p2006_p0 = pnand %p2004_p13, %p2001_p12 }
  0x67   :  { %2009 = shalt.err (!%p2006_p0)
}
  0x68   :  { %s2010_s26 = scalar_lea.vmem %s119_s1, 1024  ;;  %p2015_p2 = scmp.lt.s32.totalorder %s119_s1, %s119_s1 }
  0x69   :  { %p2011_p1 = scmp.ne.s32.totalorder %s119_s1, %s2010_s26  ;;  %p2016_p3 = scmp.lt.s32.totalorder %s2010_s26, %s2010_s26 }
  0x6b   :  { %p2017_p4 = por %p2016_p3, %p2015_p2 }
  0x6d   :  { %p2018_p5 = pnand %p2017_p4, %p2011_p1 }
  0x6f   :  { %2021 = shalt.err (!%p2018_p5)
}
  0x70   :  { %124 = dma.hbm_to_vmem [thread:$0]  %s2397_s16, 1024, %s119_s1, [#allocation12], %s2411_s25, %s2411_s25, %s2032_s30  }
  0x71   :  { %2022 = dma.done.wait [#allocation4], 512  }
  0x72   :  { %2023 = vsyncadd [#allocation4], 4294966784 }
  0x73   :  { %2024 = dma.done.wait [#allocation6], 2048  }
  0x74   :  { %2025 = vsyncadd [#allocation6], 4294965248 }
  0x75   :  { %2026 = dma.done.wait [#allocation9], 10240  }
  0x76   :  { %2027 = vsyncadd [#allocation9], 4294957056 }
  0x77   :  { %2028 = dma.done.wait [#allocation12], 1024  }
  0x78   :  { %2029 = vsyncadd [#allocation12], 4294966272  ;;  %v2042_v1 = vmov 0   ;;  %v1708_v2 = vld [vmem:[#allocation3 + $0x4] ss:$8 sps:$4 sm:$0xff]   ;;  %s2412_s30 = sld [smem:[#allocation17_spill]]  ;;  %v178_v31 = vlaneseq }
  0x79   :  { %224 = vmatprep.mubr.bf16.mxu0 %v2042_v1  ;;  %1707 = vset.pattern.permute.xlu0 %v2042_v1  ;;  %v1710_v3 = vld [vmem:[#allocation3] ss:$8 sps:$4 sm:$0xff]   ;;  %v1711_v4 = vld [vmem:[#allocation3 + $0x14] ss:$8 sps:$4 sm:$0xff]   ;;  %v1713_v5 = vld [vmem:[#allocation3 + $0x10] ss:$8 sps:$4 sm:$0xff]  }
  0x7a   :  { %192 = vmatprep.subr.bf16.mxu0 %v1708_v2  ;;  %v1714_v7 = vld [vmem:[%s2387_s6 + $0x40] sm:$0xff]   ;;  %v1716_v9 = vld [vmem:[%s2387_s6 + $0x48] sm:$0xff]   ;;  %vm188_vm0 = vcmask 261120   ;;  %v1718_v12 = vld [vmem:[%s2387_s6 + $0x50] sm:$0xff]   ;;  %v2043_v25 = vmov 0.0   ;;  %v2303_v32 = vshrl.u32 %v178_v31, 7 }
  0x7b   :  { %193 = vmatpush1.bf16.msra.mxu0 %v1710_v3  ;;  %v1715_v8 = vld [vmem:[%s2387_s6] sm:$0xff]   ;;  %1582 = vmatprep.subr.bf16.mxu1 %v1714_v7  ;;  %v1717_v11 = vld [vmem:[%s2387_s6 + $0x8] sm:$0xff]   ;;  %v1719_v13 = vld [vmem:[%s2387_s6 + $0x10] sm:$0xff]   ;;  %vm2044_vm1 = vmmov 0   ;;  %s2413_s26 = sld [smem:[#allocation19_spill]]  ;;  %vm1399_vm2 = vcmask 1040384  }
  0x7c   :  { %194 = vmatprep.subr.bf16.mxu0 %v1711_v4  ;;  %1583 = vmatpush3.bf16.msra.mxu1 %v1715_v8  ;;  %v1720_v14 = vld [vmem:[%s2387_s6 + $0x58] sm:$0xff]   ;;  %v1722_v16 = vld [vmem:[%s2387_s6 + $0x60] sm:$0xff]   ;;  %v1724_v18 = vld [vmem:[%s2387_s6 + $0x68] sm:$0xff]   ;;  %v2306_v33 = vsub.s32 0, %v2303_v32  ;;  %v2312_v35 = vsub.s32 1, %v2303_v32  ;;  %s2415_s4 = sld [smem:[#allocation18_spill]] }
  0x7d   :  { %1584 = vmatprep.subr.bf16.mxu1 %v1716_v9  ;;  %v1721_v15 = vld [vmem:[%s2387_s6 + $0x18] sm:$0xff]   ;;  %v1723_v17 = vld [vmem:[%s2387_s6 + $0x20] sm:$0xff]   ;;  %v1725_v19 = vld [vmem:[%s2387_s6 + $0x28] sm:$0xff]   ;;  %vm1443_vm4 = vcmp.lt.s32.totalorder %v178_v31, 384 }
  0x7e   :  { %v150_v6 = vld [vmem:[%s2412_s30] sm:$0x1]  ;;  %v1726_v20 = vld [vmem:[%s2387_s6 + $0x70] sm:$0xff]   ;;  %v1728_v22 = vld [vmem:[%s2387_s6 + $0x78] sm:$0xff]   ;;  %s2414_s30 = sld [smem:[#allocation20_spill]] }
  0x7f   :  { %v151_v10 = vpack.c.bf16 %v150_v6, %v150_v6  ;;  %195 = vmatpush1.bf16.msra.mxu0 %v1713_v5  ;;  %v1727_v21 = vld [vmem:[%s2387_s6 + $0x30] sm:$0xff]   ;;  %v1729_v23 = vld [vmem:[%s2387_s6 + $0x38] sm:$0xff]   ;;  %v1730_v24 = vld [vmem:[#allocation5] sm:$0xff]  }
  0x80   :  { %1585 = vmatpush3.bf16.msra.mxu1 %v1717_v11  ;;  %1631 = vmatprep.subr.bf16.mxu0 %v2043_v25  ;;  %v1731_v26 = vld [vmem:[#allocation5 + $0x8] sm:$0xff]   ;;  %v1732_v27 = vld [vmem:[#allocation5 + $0x10] sm:$0xff]   ;;  %v1733_v28 = vld [vmem:[#allocation5 + $0x18] sm:$0xff]  }
  0x81   :  { %1586 = vmatprep.subr.bf16.mxu1 %v1718_v12  ;;  %v1734_v29 = vld [vmem:[#allocation5 + $0x20] sm:$0xff]   ;;  %v1735_v30 = vld [vmem:[#allocation5 + $0x28] sm:$0xff]   ;;  %v1736_v48 = vld [vmem:[#allocation5 + $0x30] sm:$0xff]  }
  0x82   :  { %1458 = vmatmul.mubr.msk.bf16.vlgmr.msra.gmra.mrb[0].mxu0 %vm188_vm0, %v151_v10  ;;  %v156_v34 = vld [vmem:[%s2386_s5] sm:$0x3]  ;;  %v1739_v51 = vld [vmem:[#allocation7 + $0x8] sm:$0xff]   ;;  %v1740_v52 = vld [vmem:[#allocation7 + $0x10] sm:$0xff]  }
  0x83   :  { %1632 = vmatpush3.bf16.msra.mxu0 %v1730_v24  ;;  %v181_v36 = vrot.slane %v156_v34, %v2306_v33  ;;  %v185_v37 = vrot.slane %v156_v34, %v2312_v35  ;;  %v1737_v49 = vld [vmem:[#allocation5 + $0x38] sm:$0xff]   ;;  %1647 = vmatprep.mubr.msk.bf16.mxu0 %vm2044_vm1, %v2043_v25  ;;  %v1738_v50 = vld [vmem:[#allocation7] sm:$0xff]   ;;  %v1743_v55 = vld [vmem:[#allocation7 + $0x28] sm:$0xff]  }
  0x84   :  { %1587 = vmatpush3.bf16.msra.mxu1 %v1719_v13  ;;  %1633 = vmatprep.subr.bf16.mxu0 %v2043_v25  ;;  %v1741_v53 = vld [vmem:[#allocation7 + $0x18] sm:$0xff]   ;;  %v1742_v54 = vld [vmem:[#allocation7 + $0x20] sm:$0xff]   ;;  %v1744_v2 = vld [vmem:[#allocation7 + $0x30] sm:$0xff]  }
  0x85   :  { %1588 = vmatprep.subr.bf16.mxu1 %v1720_v14  ;;  %v269_v57 = vld [vmem:[%s2388_s7] sm:$0x1]  ;;  %v1746_v4 = vld [vmem:[#allocation8] ss:$16 sps:$4 sm:$0xff]   ;;  %v1748_v5 = vld [vmem:[#allocation8 + $0x4] ss:$16 sps:$4 sm:$0xff]  }
  0x86   :  { %v1745_v3 = vld [vmem:[#allocation7 + $0x38] sm:$0xff]   ;;  %v1754_v7 = vld [vmem:[#allocation8 + $0x24] ss:$16 sps:$4 sm:$0xff]   ;;  %v1752_v8 = vld [vmem:[#allocation8 + $0x20] ss:$16 sps:$4 sm:$0xff]  }
  0x87   :  { %1634 = vmatpush3.bf16.msra.mxu0 %v1731_v26  ;;  %v1751_v6 = vld [vmem:[#allocation8 + $0xc] ss:$16 sps:$4 sm:$0xff]   ;;  %v1760_v9 = vld [vmem:[#allocation8 + $0x44] ss:$16 sps:$4 sm:$0xff]   ;;  %v1758_v10 = vld [vmem:[#allocation8 + $0x40] ss:$16 sps:$4 sm:$0xff]  }
  0x88   :  { %1589 = vmatpush3.bf16.msra.mxu1 %v1721_v15  ;;  %1635 = vmatprep.subr.bf16.mxu0 %v2043_v25  ;;  %v1766_v11 = vld [vmem:[#allocation8 + $0x64] ss:$16 sps:$4 sm:$0xff]   ;;  %v1764_v12 = vld [vmem:[#allocation8 + $0x60] ss:$16 sps:$4 sm:$0xff]  }
  0x89   :  { %1590 = vmatprep.subr.bf16.mxu1 %v1722_v16  ;;  %v1772_v13 = vld [vmem:[#allocation8 + $0x84] ss:$16 sps:$4 sm:$0xff]   ;;  %v1770_v14 = vld [vmem:[#allocation8 + $0x80] ss:$16 sps:$4 sm:$0xff]  }
  0x8a   :  { %v1778_v15 = vld [vmem:[#allocation8 + $0xa4] ss:$16 sps:$4 sm:$0xff]   ;;  %v1776_v16 = vld [vmem:[#allocation8 + $0xa0] ss:$16 sps:$4 sm:$0xff]  }
  0x8b   :  { %1636 = vmatpush3.bf16.msra.mxu0 %v1732_v27  ;;  %v1800_v24 = vld [vmem:[#allocation8 + $0x120] ss:$16 sps:$4 sm:$0xff]   ;;  %v1808_v26 = vld [vmem:[#allocation8 + $0x144] ss:$16 sps:$4 sm:$0xff]  }
  0x8c   :  { %1591 = vmatpush3.bf16.msra.mxu1 %v1723_v17  ;;  %1637 = vmatprep.subr.bf16.mxu0 %v2043_v25  ;;  %v1784_v17 = vld [vmem:[#allocation8 + $0xc4] ss:$16 sps:$4 sm:$0xff]   ;;  %v1806_v27 = vld [vmem:[#allocation8 + $0x140] ss:$16 sps:$4 sm:$0xff]  }
  0x8d   :  { %1592 = vmatprep.subr.bf16.mxu1 %v1724_v18  ;;  %v1782_v18 = vld [vmem:[#allocation8 + $0xc0] ss:$16 sps:$4 sm:$0xff]  }
  0x8e   :  { %v1818_v34 = vld [vmem:[#allocation8 + $0x180] ss:$16 sps:$4 sm:$0xff]  }
  0x8f   :  { %1638 = vmatpush3.bf16.msra.mxu0 %v1733_v28  ;;  %v1814_v28 = vld [vmem:[#allocation8 + $0x164] ss:$16 sps:$4 sm:$0xff]  }
  0x90   :  { %1593 = vmatpush3.bf16.msra.mxu1 %v1725_v19  ;;  %1639 = vmatprep.subr.bf16.mxu0 %v2043_v25  ;;  %v1790_v19 = vld [vmem:[#allocation8 + $0xe4] ss:$16 sps:$4 sm:$0xff]  }
  0x91   :  { %1594 = vmatprep.subr.bf16.mxu1 %v1726_v20  ;;  %v1788_v20 = vld [vmem:[#allocation8 + $0xe0] ss:$16 sps:$4 sm:$0xff]  }
  0x93   :  { %1640 = vmatpush3.bf16.msra.mxu0 %v1734_v29  ;;  %v1812_v29 = vld [vmem:[#allocation8 + $0x160] ss:$16 sps:$4 sm:$0xff]  }
  0x94   :  { %1595 = vmatpush3.bf16.msra.mxu1 %v1727_v21  ;;  %1641 = vmatprep.subr.bf16.mxu0 %v2043_v25  ;;  %v1796_v21 = vld [vmem:[#allocation8 + $0x104] ss:$16 sps:$4 sm:$0xff]  }
  0x95   :  { %1596 = vmatprep.subr.bf16.mxu1 %v1728_v22  ;;  %v1794_v22 = vld [vmem:[#allocation8 + $0x100] ss:$16 sps:$4 sm:$0xff]  }
  0x97   :  { %1642 = vmatpush3.bf16.msra.mxu0 %v1735_v30  ;;  %v1820_v30 = vld [vmem:[#allocation8 + $0x184] ss:$16 sps:$4 sm:$0xff]  }
  0x98   :  { %1597 = vmatpush3.bf16.msra.mxu1 %v1729_v23  ;;  %1643 = vmatprep.subr.bf16.mxu0 %v2043_v25  ;;  %v1802_v23 = vld [vmem:[#allocation8 + $0x124] ss:$16 sps:$4 sm:$0xff]  }
  0x99   :  { %1651 = vmatprep.subr.bf16.mxu1 %v2043_v25 }
  0x9b   :  { %1644 = vmatpush3.bf16.msra.mxu0 %v1736_v48 }
  0x9c   :  { %1645 = vmatprep.subr.bf16.mxu0 %v2043_v25 }
  0x9f   :  { %1646 = vmatpush3.bf16.msra.mxu0 %v1737_v49  ;;  %v1757_v49 = vld [vmem:[#allocation8 + $0x2c] ss:$16 sps:$4 sm:$0xff]  }
  0xa0   :  { %1030 = vmatprep.subr.bf16.mxu0 %v1748_v5  ;;  %v1809_v5 = vld [vmem:[#allocation8 + $0x148] ss:$16 sps:$4 sm:$0xff]  }
 0x155   :  { %v226_v38 = vpop.f32.mrb[0].mxu0 }
 0x156   :  { %v227_v39 = vadd.f32 %v226_v38, %v181_v36  ;;  %v228_v40 = vpop.f32.mrb[1].mxu0  ;;  %v1826_v36 = vld [vmem:[#allocation8 + $0x1a4] ss:$16 sps:$4 sm:$0xff]  }
 0x157   :  { %v229_v41 = vadd.f32 %v228_v40, %v185_v37  ;;  %v230_v42 = vpop.f32.mrb[2].mxu0  ;;  %v1824_v37 = vld [vmem:[#allocation8 + $0x1a0] ss:$16 sps:$4 sm:$0xff]   ;;  %v1832_v38 = vld [vmem:[#allocation8 + $0x1c4] ss:$16 sps:$4 sm:$0xff]  }
 0x158   :  { %v233_v43 = vmax.f32 %v227_v39, 0.0  ;;  %v231_v44 = vpop.f32.mrb[3].mxu0  ;;  %v1830_v39 = vld [vmem:[#allocation8 + $0x1c0] ss:$16 sps:$4 sm:$0xff]   ;;  %v424_v40 = vld [vmem:[%s2390_s9] sm:$0x1] }
 0x159   :  { %v234_v45 = vmax.f32 %v229_v41, 0.0 }
 0x15a   :  { %v235_v47 = vpack.c.bf16 %v233_v43, %v233_v43 }
 0x15b   :  { %v236_v46 = vpack.c.bf16 %v234_v45, %v234_v45 }
 0x15d   :  { %398 = vmatprep.mubr.bf16.mxu1 %v236_v46 }
 0x15e   :  { %399 = vmatmul.mubr.bf16.vlgmr.msra.gmra.mrb[0].mxu1 %v235_v47  ;;  %v1749_v47 = vld [vmem:[#allocation8 + $0x8] ss:$16 sps:$4 sm:$0xff]  }
 0x15f   :  { %1667 = vmatprep.mubr.msk.bf16.mxu1 %vm2044_vm1, %v2043_v25  ;;  %1652 = vmatpush3.bf16.msra.mxu1 %v1738_v50  ;;  %v1755_v50 = vld [vmem:[#allocation8 + $0x28] ss:$16 sps:$4 sm:$0xff]  }
 0x160   :  { %1653 = vmatprep.subr.bf16.mxu1 %v2043_v25 }
 0x163   :  { %1654 = vmatpush3.bf16.msra.mxu1 %v1739_v51  ;;  %v1763_v51 = vld [vmem:[#allocation8 + $0x4c] ss:$16 sps:$4 sm:$0xff]  }
 0x164   :  { %1655 = vmatprep.subr.bf16.mxu1 %v2043_v25 }
 0x167   :  { %1656 = vmatpush3.bf16.msra.mxu1 %v1740_v52  ;;  %v1761_v52 = vld [vmem:[#allocation8 + $0x48] ss:$16 sps:$4 sm:$0xff]  }
 0x168   :  { %1657 = vmatprep.subr.bf16.mxu1 %v2043_v25 }
 0x16b   :  { %1658 = vmatpush3.bf16.msra.mxu1 %v1741_v53  ;;  %v1769_v53 = vld [vmem:[#allocation8 + $0x6c] ss:$16 sps:$4 sm:$0xff]  }
 0x16c   :  { %1659 = vmatprep.subr.bf16.mxu1 %v2043_v25 }
 0x16f   :  { %1660 = vmatpush3.bf16.msra.mxu1 %v1742_v54  ;;  %v1767_v54 = vld [vmem:[#allocation8 + $0x68] ss:$16 sps:$4 sm:$0xff]  }
 0x170   :  { %1661 = vmatprep.subr.bf16.mxu1 %v2043_v25 }
 0x173   :  { %1662 = vmatpush3.bf16.msra.mxu1 %v1743_v55  ;;  %v1775_v55 = vld [vmem:[#allocation8 + $0x8c] ss:$16 sps:$4 sm:$0xff]  }
 0x174   :  { %1663 = vmatprep.subr.bf16.mxu1 %v2043_v25 }
 0x177   :  { %1664 = vmatpush3.bf16.msra.mxu1 %v1744_v2  ;;  %v1805_v2 = vld [vmem:[#allocation8 + $0x12c] ss:$16 sps:$4 sm:$0xff]  }
 0x178   :  { %1665 = vmatprep.subr.bf16.mxu1 %v2043_v25 }
 0x17b   :  { %1666 = vmatpush3.bf16.msra.mxu1 %v1745_v3  ;;  %v1803_v3 = vld [vmem:[#allocation8 + $0x128] ss:$16 sps:$4 sm:$0xff]  }
 0x17c   :  { %1071 = vmatprep.subr.bf16.mxu1 %v1751_v6  ;;  %v1817_v6 = vld [vmem:[#allocation8 + $0x16c] ss:$16 sps:$4 sm:$0xff]  }
 0x231   :  { %v1598_v56 = vpop.f32.mrb[0].mxu1 }
 0x232   :  { %v1599_v58 = vpop.f32.mrb[1].mxu1 }
 0x233   :  { %v1600_v59 = vadd.f32 %v1599_v58, %v1598_v56  ;;  %v1601_v60 = vpop.f32.mrb[2].mxu1  ;;  %v1773_v56 = vld [vmem:[#allocation8 + $0x88] ss:$16 sps:$4 sm:$0xff]  }
 0x234   :  { %v1602_v61 = vpop.f32.mrb[3].mxu1  ;;  %v1779_v58 = vld [vmem:[#allocation8 + $0xa8] ss:$16 sps:$4 sm:$0xff]  }
 0x235   :  { %v401_v62 = vadd.f32 %v1600_v59, %v269_v57  ;;  %v1781_v57 = vld [vmem:[#allocation8 + $0xac] ss:$16 sps:$4 sm:$0xff]   ;;  %v1785_v60 = vld [vmem:[#allocation8 + $0xc8] ss:$16 sps:$4 sm:$0xff]  }
 0x236   :  { %v1787_v59 = vld [vmem:[#allocation8 + $0xcc] ss:$16 sps:$4 sm:$0xff]  }
 0x237   :  { %v406_v63 = vmax.f32 %v401_v62, 0.0  ;;  %v1793_v61 = vld [vmem:[#allocation8 + $0xec] ss:$16 sps:$4 sm:$0xff]   ;;  %v1791_v62 = vld [vmem:[#allocation8 + $0xe8] ss:$16 sps:$4 sm:$0xff]  }
 0x239   :  { %v407_v0 = vpack.c.bf16 %v406_v63, %v406_v63  ;;  %v1799_v63 = vld [vmem:[#allocation8 + $0x10c] ss:$16 sps:$4 sm:$0xff]  }
 0x23b   :  { %1648 = vmatmul.mubr.bf16.vlgmr.msra.gmra.mrb[4].mxu0 %v407_v0  ;;  %v1797_v0 = vld [vmem:[#allocation8 + $0x108] ss:$16 sps:$4 sm:$0xff]  }
 0x23c   :  { %1031 = vmatpush1.bf16.msra.mxu0 %v1746_v4  ;;  %v1811_v4 = vld [vmem:[#allocation8 + $0x14c] ss:$16 sps:$4 sm:$0xff]  }
 0x23d   :  { %1032 = vmatprep.subr.bf16.mxu0 %v1754_v7  ;;  %v1815_v7 = vld [vmem:[#allocation8 + $0x168] ss:$16 sps:$4 sm:$0xff]  }
 0x240   :  { %1033 = vmatpush1.bf16.msra.mxu0 %v1752_v8  ;;  %v1823_v8 = vld [vmem:[#allocation8 + $0x18c] ss:$16 sps:$4 sm:$0xff]  }
 0x241   :  { %1034 = vmatprep.subr.bf16.mxu0 %v1760_v9  ;;  %v1821_v9 = vld [vmem:[#allocation8 + $0x188] ss:$16 sps:$4 sm:$0xff]  }
 0x244   :  { %1035 = vmatpush1.bf16.msra.mxu0 %v1758_v10  ;;  %v1829_v10 = vld [vmem:[#allocation8 + $0x1ac] ss:$16 sps:$4 sm:$0xff]  }
 0x245   :  { %1036 = vmatprep.subr.bf16.mxu0 %v1766_v11  ;;  %v1827_v11 = vld [vmem:[#allocation8 + $0x1a8] ss:$16 sps:$4 sm:$0xff]  }
 0x248   :  { %1037 = vmatpush1.bf16.msra.mxu0 %v1764_v12  ;;  %v1835_v12 = vld [vmem:[#allocation8 + $0x1cc] ss:$16 sps:$4 sm:$0xff]  }
 0x249   :  { %1038 = vmatprep.subr.bf16.mxu0 %v1772_v13  ;;  %v1833_v13 = vld [vmem:[#allocation8 + $0x1c8] ss:$16 sps:$4 sm:$0xff]  }
 0x24c   :  { %1039 = vmatpush1.bf16.msra.mxu0 %v1770_v14  ;;  %v1838_v14 = vld [vmem:[#allocation8 + $0x1e4] ss:$16 sps:$4 sm:$0xff]  }
 0x24d   :  { %1040 = vmatprep.subr.bf16.mxu0 %v1778_v15  ;;  %v1841_v15 = vld [vmem:[#allocation8 + $0x1ec] ss:$16 sps:$4 sm:$0xff]  }
 0x250   :  { %1041 = vmatpush1.bf16.msra.mxu0 %v1776_v16  ;;  %v1836_v16 = vld [vmem:[#allocation8 + $0x1e0] ss:$16 sps:$4 sm:$0xff]  }
 0x251   :  { %1042 = vmatprep.subr.bf16.mxu0 %v1784_v17  ;;  %v1839_v17 = vld [vmem:[#allocation8 + $0x1e8] ss:$16 sps:$4 sm:$0xff]  }
 0x254   :  { %1043 = vmatpush1.bf16.msra.mxu0 %v1782_v18  ;;  %v621_v18 = vld [vmem:[%s2413_s26] sm:$0x1] }
 0x255   :  { %1044 = vmatprep.subr.bf16.mxu0 %v1790_v19  ;;  %v623_v19 = vpack.c.bf16 %v621_v18, %v621_v18 }
 0x257   :  { %1062 = vmatprep.mubr.bf16.mxu0 %v623_v19 }
 0x258   :  { %1045 = vmatpush1.bf16.msra.mxu0 %v1788_v20  ;;  %v531_v20 = vld [vmem:[%s2392_s11] sm:$0x1] }
 0x259   :  { %1046 = vmatprep.subr.bf16.mxu0 %v1796_v21 }
 0x25c   :  { %1047 = vmatpush1.bf16.msra.mxu0 %v1794_v22 }
 0x25d   :  { %1048 = vmatprep.subr.bf16.mxu0 %v1802_v23 }
 0x260   :  { %1049 = vmatpush1.bf16.msra.mxu0 %v1800_v24 }
 0x261   :  { %1050 = vmatprep.subr.bf16.mxu0 %v1808_v26 }
 0x264   :  { %1051 = vmatpush1.bf16.msra.mxu0 %v1806_v27 }
 0x265   :  { %1052 = vmatprep.subr.bf16.mxu0 %v1814_v28 }
 0x268   :  { %1053 = vmatpush1.bf16.msra.mxu0 %v1812_v29  ;;  %v1844_v29 = vld [vmem:[#allocation10 + $0x4] ss:$8 sps:$4 sm:$0xff]  }
 0x269   :  { %1054 = vmatprep.subr.bf16.mxu0 %v1820_v30  ;;  %v1842_v30 = vld [vmem:[#allocation10] ss:$8 sps:$4 sm:$0xff]  }
 0x26c   :  { %1055 = vmatpush1.bf16.msra.mxu0 %v1818_v34  ;;  %v1847_v34 = vld [vmem:[#allocation10 + $0x14] ss:$8 sps:$4 sm:$0xff]  }
 0x26d   :  { %1056 = vmatprep.subr.bf16.mxu0 %v1826_v36  ;;  %v1845_v36 = vld [vmem:[#allocation10 + $0x10] ss:$8 sps:$4 sm:$0xff]  }
 0x270   :  { %1057 = vmatpush1.bf16.msra.mxu0 %v1824_v37  ;;  %v1850_v37 = vld [vmem:[#allocation10 + $0x24] ss:$8 sps:$4 sm:$0xff]  }
 0x271   :  { %1058 = vmatprep.subr.bf16.mxu0 %v1832_v38  ;;  %v1848_v38 = vld [vmem:[#allocation10 + $0x20] ss:$8 sps:$4 sm:$0xff]  }
 0x274   :  { %1059 = vmatpush1.bf16.msra.mxu0 %v1830_v39  ;;  %v1853_v39 = vld [vmem:[#allocation10 + $0x34] ss:$8 sps:$4 sm:$0xff]  }
 0x275   :  { %1060 = vmatprep.subr.bf16.mxu0 %v1838_v14 }
 0x278   :  { %1061 = vmatpush1.bf16.msra.mxu0 %v1836_v16 }
 0x279   :  { %1246 = vmatprep.subr.bf16.mxu0 %v1844_v29 }
 0x30e   :  { %v507_v41 = vpop.f32.mrb[4].mxu0 }
 0x30f   :  { %v508_v42 = vadd.f32 %v507_v41, %v424_v40  ;;  %v1649_v43 = vpop.f32.mrb[5].mxu0  ;;  %v1851_v40 = vld [vmem:[#allocation10 + $0x30] ss:$8 sps:$4 sm:$0xff]   ;;  %v1854_v41 = vld [vmem:[#allocation10 + $0x40] ss:$8 sps:$4 sm:$0xff]  }
 0x310   :  { %v510_v44 = vpop.f32.mrb[6].mxu0  ;;  %v1857_v43 = vld [vmem:[#allocation10 + $0x50] ss:$8 sps:$4 sm:$0xff]  }
 0x311   :  { %v513_v45 = vmax.f32 %v508_v42, 0.0  ;;  %v1650_v46 = vpop.f32.mrb[7].mxu0  ;;  %v1859_v42 = vld [vmem:[#allocation10 + $0x54] ss:$8 sps:$4 sm:$0xff]   ;;  %v1862_v44 = vld [vmem:[#allocation10 + $0x64] ss:$8 sps:$4 sm:$0xff]  }
 0x312   :  { %v1865_v46 = vld [vmem:[#allocation10 + $0x74] ss:$8 sps:$4 sm:$0xff]  }
 0x313   :  { %v514_v48 = vpack.c.bf16 %v513_v45, %v513_v45  ;;  %v1860_v45 = vld [vmem:[#allocation10 + $0x60] ss:$8 sps:$4 sm:$0xff]  }
 0x315   :  { %1668 = vmatmul.mubr.bf16.vlgmr.msra.gmra.mrb[4].mxu1 %v514_v48  ;;  %v1866_v48 = vld [vmem:[#allocation11] sm:$0xff]  }
 0x316   :  { %1072 = vmatpush1.bf16.msra.mxu1 %v1749_v47  ;;  %1103 = vmatprep.mubr.bf16.mxu1 %v623_v19  ;;  %v1863_v47 = vld [vmem:[#allocation10 + $0x70] ss:$8 sps:$4 sm:$0xff]   ;;  %v1131_v19 = vld [vmem:[%s2414_s30] sm:$0x1] }
 0x317   :  { %1073 = vmatprep.subr.bf16.mxu1 %v1757_v49  ;;  %v1867_v49 = vld [vmem:[#allocation11 + $0x8] sm:$0xff]  }
 0x31a   :  { %1074 = vmatpush1.bf16.msra.mxu1 %v1755_v50  ;;  %v1868_v50 = vld [vmem:[#allocation11 + $0x10] sm:$0xff]  }
 0x31b   :  { %1075 = vmatprep.subr.bf16.mxu1 %v1763_v51  ;;  %v1869_v51 = vld [vmem:[#allocation11 + $0x18] sm:$0xff]  }
 0x31e   :  { %1076 = vmatpush1.bf16.msra.mxu1 %v1761_v52  ;;  %v1870_v52 = vld [vmem:[#allocation11 + $0x20] sm:$0xff]  }
 0x31f   :  { %1077 = vmatprep.subr.bf16.mxu1 %v1769_v53  ;;  %v1871_v53 = vld [vmem:[#allocation11 + $0x28] sm:$0xff]  }
 0x322   :  { %1078 = vmatpush1.bf16.msra.mxu1 %v1767_v54  ;;  %v688_v54 = vld [vmem:[%s2394_s13] sm:$0xf] }
 0x323   :  { %1079 = vmatprep.subr.bf16.mxu1 %v1775_v55  ;;  %v1013_v55 = vrot.slane %v688_v54, %v2306_v33 }
 0x326   :  { %1080 = vmatpush1.bf16.msra.mxu1 %v1773_v56  ;;  %v1017_v56 = vrot.slane %v688_v54, %v2312_v35 }
 0x327   :  { %1081 = vmatprep.subr.bf16.mxu1 %v1781_v57 }
 0x32a   :  { %1082 = vmatpush1.bf16.msra.mxu1 %v1779_v58 }
 0x32b   :  { %1083 = vmatprep.subr.bf16.mxu1 %v1787_v59  ;;  %v1024_v59 = vsub.s32 3, %v2303_v32 }
 0x32e   :  { %1084 = vmatpush1.bf16.msra.mxu1 %v1785_v60 }
 0x32f   :  { %1085 = vmatprep.subr.bf16.mxu1 %v1793_v61 }
 0x332   :  { %1086 = vmatpush1.bf16.msra.mxu1 %v1791_v62 }
 0x333   :  { %1087 = vmatprep.subr.bf16.mxu1 %v1799_v63 }
 0x336   :  { %1088 = vmatpush1.bf16.msra.mxu1 %v1797_v0 }
 0x337   :  { %1089 = vmatprep.subr.bf16.mxu1 %v1805_v2 }
 0x33a   :  { %1090 = vmatpush1.bf16.msra.mxu1 %v1803_v3 }
 0x33b   :  { %1091 = vmatprep.subr.bf16.mxu1 %v1811_v4 }
 0x33e   :  { %1092 = vmatpush1.bf16.msra.mxu1 %v1809_v5 }
 0x33f   :  { %1093 = vmatprep.subr.bf16.mxu1 %v1817_v6 }
 0x342   :  { %1094 = vmatpush1.bf16.msra.mxu1 %v1815_v7  ;;  %v1025_v7 = vrot.slane %v688_v54, %v1024_v59  ;;  %v1406_v59 = vand.u32 127, %v178_v31 }
 0x343   :  { %1095 = vmatprep.subr.bf16.mxu1 %v1823_v8  ;;  %v1020_v8 = vsub.s32 2, %v2303_v32 }
 0x344   :  { %vm1407_vm3 = vcmp.eq.s32.totalorder %v1406_v59, 64 }
 0x346   :  { %1096 = vmatpush1.bf16.msra.mxu1 %v1821_v9 }
 0x347   :  { %1097 = vmatprep.subr.bf16.mxu1 %v1829_v10  ;;  %v1021_v10 = vrot.slane %v688_v54, %v1020_v8 }
 0x34a   :  { %1098 = vmatpush1.bf16.msra.mxu1 %v1827_v11 }
 0x34b   :  { %1099 = vmatprep.subr.bf16.mxu1 %v1835_v12 }
 0x34e   :  { %1100 = vmatpush1.bf16.msra.mxu1 %v1833_v13 }
 0x34f   :  { %1101 = vmatprep.subr.bf16.mxu1 %v1841_v15 }
 0x352   :  { %1102 = vmatpush1.bf16.msra.mxu1 %v1839_v17 }
 0x353   :  { %1671 = vmatprep.subr.bf16.mxu1 %v2043_v25 }
 0x3e8   :  { %v614_v21 = vpop.f32.mrb[4].mxu1 }
 0x3e9   :  { %v615_v22 = vadd.f32 %v614_v21, %v531_v20  ;;  %v1669_v23 = vpop.f32.mrb[5].mxu1 }
 0x3ea   :  { %v617_v24 = vpop.f32.mrb[6].mxu1 }
 0x3eb   :  { %v620_v26 = vmax.f32 %v615_v22, 0.0  ;;  %v1670_v27 = vpop.f32.mrb[7].mxu1 }
 0x3ed   :  { %v622_v28 = vpack.c.bf16 %v620_v26, %v620_v26 }
 0x3ef   :  { %1063 = vmatmul.mubr.bf16.vlgmr.msra.gmra.mrb[8].mxu0 %v622_v28  ;;  %1104 = vmatmul.mubr.bf16.vlgmr.msra.gmra.mrb[8].mxu1 %v622_v28 }
 0x3f0   :  { %1278 = vmatprep.mubr.bf16.mxu0 %v2042_v1  ;;  %1687 = vmatprep.mubr.msk.bf16.mxu1 %vm2044_vm1, %v2043_v25  ;;  %v1856_v1 = vld [vmem:[#allocation10 + $0x44] ss:$8 sps:$4 sm:$0xff]  }
 0x3f1   :  { %1247 = vmatpush1.bf16.msra.mxu0 %v1842_v30  ;;  %1672 = vmatpush3.bf16.msra.mxu1 %v1866_v48 }
 0x3f2   :  { %1248 = vmatprep.subr.bf16.mxu0 %v1847_v34  ;;  %1673 = vmatprep.subr.bf16.mxu1 %v2043_v25 }
 0x3f5   :  { %1249 = vmatpush1.bf16.msra.mxu0 %v1845_v36  ;;  %1674 = vmatpush3.bf16.msra.mxu1 %v1867_v49  ;;  %v1872_v36 = vld [vmem:[#allocation11 + $0x30] sm:$0xff]  }
 0x3f6   :  { %1250 = vmatprep.subr.bf16.mxu0 %v1850_v37  ;;  %1675 = vmatprep.subr.bf16.mxu1 %v2043_v25  ;;  %v1873_v37 = vld [vmem:[#allocation11 + $0x38] sm:$0xff]  }
 0x3f9   :  { %1251 = vmatpush1.bf16.msra.mxu0 %v1848_v38  ;;  %1676 = vmatpush3.bf16.msra.mxu1 %v1868_v50  ;;  %v1154_v38 = vld [vmem:[%s2396_s15] sm:$0x3] }
 0x3fa   :  { %1252 = vmatprep.subr.bf16.mxu0 %v1853_v39  ;;  %1677 = vmatprep.subr.bf16.mxu1 %v2043_v25  ;;  %v1239_v39 = vrot.slane %v1154_v38, %v2306_v33  ;;  %v1403_v33 = vld [vmem:[#allocation2] sm:$0x1] }
 0x3fd   :  { %1253 = vmatpush1.bf16.msra.mxu0 %v1851_v40  ;;  %1678 = vmatpush3.bf16.msra.mxu1 %v1869_v51  ;;  %v1243_v40 = vrot.slane %v1154_v38, %v2312_v35 }
 0x3fe   :  { %1254 = vmatprep.subr.bf16.mxu0 %v1856_v1  ;;  %1679 = vmatprep.subr.bf16.mxu1 %v2043_v25 }
 0x401   :  { %1255 = vmatpush1.bf16.msra.mxu0 %v1854_v41  ;;  %1680 = vmatpush3.bf16.msra.mxu1 %v1870_v52 }
 0x402   :  { %1256 = vmatprep.subr.bf16.mxu0 %v1859_v42  ;;  %1681 = vmatprep.subr.bf16.mxu1 %v2043_v25 }
 0x405   :  { %1257 = vmatpush1.bf16.msra.mxu0 %v1857_v43  ;;  %1682 = vmatpush3.bf16.msra.mxu1 %v1871_v53 }
 0x406   :  { %1258 = vmatprep.subr.bf16.mxu0 %v1862_v44  ;;  %1683 = vmatprep.subr.bf16.mxu1 %v2043_v25 }
 0x409   :  { %1259 = vmatpush1.bf16.msra.mxu0 %v1860_v45  ;;  %1684 = vmatpush3.bf16.msra.mxu1 %v1872_v36 }
 0x40a   :  { %1260 = vmatprep.subr.bf16.mxu0 %v1865_v46  ;;  %1685 = vmatprep.subr.bf16.mxu1 %v2043_v25  ;;  %v1397_v25 = vld [vmem:[%s2399_s18] sm:$0x1] }
 0x40d   :  { %1261 = vmatpush1.bf16.msra.mxu0 %v1863_v47  ;;  %1686 = vmatpush3.bf16.msra.mxu1 %v1873_v37 }
 0x4c2   :  { %v1064_v57 = vpop.f32.mrb[8].mxu0  ;;  %v1105_v58 = vpop.f32.mrb[8].mxu1 }
 0x4c3   :  { %v1065_v60 = vadd.f32 %v1064_v57, %v1013_v55  ;;  %v1066_v61 = vpop.f32.mrb[9].mxu0  ;;  %v1107_v62 = vpop.f32.mrb[9].mxu1  ;;  %v1106_v12 = vadd.f32 %v1105_v58, %v1021_v10  ;;  %v1306_v58 = vld [vmem:[%s2398_s17] sm:$0x1] }
 0x4c4   :  { %v1067_v63 = vadd.f32 %v1066_v61, %v1017_v56  ;;  %v1068_v0 = vpop.f32.mrb[10].mxu0  ;;  %v1109_v2 = vpop.f32.mrb[10].mxu1  ;;  %v1108_v9 = vadd.f32 %v1107_v62, %v1025_v7  ;;  %v2045_v56 = vmov 1966171168   ;;  %v1395_v62 = vld [vmem:[%s2415_s4] sm:$0x1] }
 0x4c5   :  { %v1555_v3 = vmul.f32 -1.442695, %v1065_v60  ;;  %v1069_v4 = vpop.f32.mrb[11].mxu0  ;;  %v1110_v5 = vpop.f32.mrb[11].mxu1  ;;  %v1419_v57 = vunpack.c.l.s4 %v2045_v56 }
 0x4c6   :  { %v1556_v6 = vmul.f32 -1.442695, %v1067_v63  ;;  %v1557_v11 = vmul.f32 -1.442695, %v1108_v9 }
 0x4c7   :  { %1874 = vpow2.f32 %v1555_v3  ;;  %v1420_v60 = vunpack.c.0.s8 %v1419_v57 }
 0x4c8   :  { %1876 = vpow2.f32 %v1556_v6 }
 0x4c9   :  { %1878 = vpow2.f32 %v1557_v11  ;;  %v1423_v63 = vsub.s32 %v1420_v60, %v2303_v32 }
 0x4ca   :  { %1880 = vtanh.f32 %v1106_v12 }
 0x4d1   :  { %v1875_v13 = vpop.eup %1874 }
 0x4d2   :  { %v1877_v14 = vpop.eup %1876  ;;  %v1115_v15 = vadd.f32 1.0, %v1875_v13 }
 0x4d3   :  { %v1121_v16 = vadd.f32 1.0, %v1877_v14  ;;  %v1879_v17 = vpop.eup %1878 }
 0x4d4   :  { %1882 = vrcp.f32 %v1115_v15  ;;  %v1881_v18 = vpop.eup %1880  ;;  %v1128_v23 = vadd.f32 1.0, %v1879_v17 }
 0x4d5   :  { %1884 = vrcp.f32 %v1121_v16 }
 0x4d6   :  { %1886 = vrcp.f32 %v1128_v23 }
 0x4de   :  { %v1883_v20 = vpop.eup %1882 }
 0x4df   :  { %v1885_v21 = vpop.eup %1884  ;;  %v1133_v22 = vmul.f32 %v1883_v20, %v1881_v18 }
 0x4e0   :  { %v1132_v24 = vmul.f32 %v1885_v21, %v1131_v19  ;;  %v1887_v27 = vpop.eup %1886 }
 0x4e2   :  { %v1134_v26 = vadd.f32 %v1133_v22, %v1132_v24 }
 0x4e4   :  { %1888 = vtanh.f32 %v1134_v26 }
 0x4ee   :  { %v1889_v28 = vpop.eup %1888 }
 0x4ef   :  { %v1136_v29 = vmul.f32 %v1889_v28, %v1887_v27 }
 0x4f1   :  { %v1137_v30 = vpack.c.bf16 %v1136_v29, %v1136_v29  ;;  %v1417_v34 = vcombine.low %v1136_v29, %v1134_v26 }
 0x4f3   :  { %1279 = vmatmul.mubr.bf16.vlgmr.msra.gmra.mrb[12].mxu0 %v1137_v30  ;;  %v1424_v4 = vrot.slane %v1417_v34, %v1423_v63 }
 0x5c6   :  { %v1280_v1 = vpop.f32.mrb[12].mxu0 }
 0x5c7   :  { %v1281_v41 = vadd.f32 %v1280_v1, %v1239_v39  ;;  %v1282_v42 = vpop.f32.mrb[13].mxu0 }
 0x5c8   :  { %v1283_v43 = vadd.f32 %v1282_v42, %v1243_v40  ;;  %v1284_v44 = vpop.f32.mrb[14].mxu0 }
 0x5c9   :  { %v1287_v45 = vmax.f32 %v1281_v41, 0.0  ;;  %v1285_v46 = vpop.f32.mrb[15].mxu0 }
 0x5ca   :  { %v1288_v47 = vmax.f32 %v1283_v43, 0.0 }
 0x5cb   :  { %v1289_v48 = vpack.c.bf16 %v1287_v45, %v1287_v45 }
 0x5cc   :  { %v1398_v49 = vmul.f32 %v1397_v25, %v1288_v47 }
 0x5cd   :  { %1688 = vmatmul.mubr.bf16.vlgmr.msra.gmra.mrb[12].mxu1 %v1289_v48 }
 0x5ce   :  { %v1400_v50 = vsel %vm1399_vm2, %v1398_v49, 0.0 }
 0x5cf   :  { %1401 = vadd.xlane.f32.xlu0 %v1400_v50 }
 0x65c   :  { %v1402_v35 = vpop.xlane.xlu0 %1401 }
 0x65d   :  { %v1404_v51 = vadd.f32 %v1403_v33, %v1402_v35 }
 0x65f   :  { %1410 = vperm.xlu0 %1707, %v1404_v51  }
 0x6a0   :  { %v1389_v52 = vpop.f32.mrb[12].mxu1 }
 0x6a1   :  { %v1689_v53 = vpop.f32.mrb[13].mxu1  ;;  %v1390_v61 = vadd.f32 %v1389_v52, %v1306_v58 }
 0x6a2   :  { %v1392_v54 = vpop.f32.mrb[14].mxu1 }
 0x6a3   :  { %v1690_v55 = vpop.f32.mrb[15].mxu1  ;;  %v1396_v0 = vadd.f32 %v1395_v62, %v1390_v61 }
 0x6de   :  { %v1411_v2 = vpop.permute.xlu0 %1410 }
 0x6df   :  { %v1413_v3 = vsel %vm1407_vm3, %v1411_v2, %v1396_v0 }
 0x6e0   :  { %v1431_v5 = vrot.slane %v1413_v3, %v1423_v63 }
 0x6e2   :  { %v1432_v6 = vcombine.low %v1424_v4, %v1431_v5 }
 0x6e4   :  { %v1439_v7 = vrot.slane %v1432_v6, %v1423_v63 }
 0x6e6   :  { %1445 = vst.msk [vmem:[%s2401_s20] sm:$0x7] %vm1443_vm4, %v1439_v7 }
 0x6e7   :  { %1450 = vsyncpa [#allocation4], 1 }
 0x6e8   :  { %1451 = vsyncpa [#allocation6], 1 }
 0x6e9   :  { %1452 = vsyncpa [#allocation9], 1 }
 0x6ea   :  { %1453 = vsyncpa [#allocation12], 1 }

</bundles_post_ra>
